<compile_context>
chip_gen: v6e
topology: v6e:2x2x1
jax: 0.10.0
libtpu: 0.0.40
codegen_flags: <defaults>
</compile_context>

<pallas_src>
import functools

import jax
import jax.numpy as jnp
from jax.experimental import pallas as pl
from jax.experimental.pallas import tpu as pltpu


# ------------------------------- tiling helpers -------------------------------

_TM, _TN, _TK = 256, 512, 512          # _TN=512 -> whole Cout per tile in this net


def _round_up(x, m):
    return ((x + m - 1) // m) * m


def _dim_tile(d, pref, align):
    """(padded_dim, tile): tile | padded_dim, tile % align == 0, minimal padding."""
    dp = _round_up(d, align)
    if dp <= pref:                      # whole dim in one tile (e.g. tn == Np)
        return dp, dp
    t = (pref // align) * align
    while t > 0 and dp % t:
        t -= align
    if t < pref // 2:                   # no decent divisor -> pad out to `pref` tiles
        return _round_up(d, pref), pref
    return dp, t


def _mm_dims(M, K, N):
    m = _dim_tile(M, _TM, 16)           # 16: bf16 sublane packing
    k = _dim_tile(K, _TK, 128)
    n = _dim_tile(N, _TN, 128)
    return m, k, n


def _vmem_limit_bytes():
    # ~48 MiB on v7x (64 MiB/TC physical), ~96 MiB on v5e/v6e (128 MiB physical).
    try:
        cap = int(pltpu.get_tpu_info().vmem_capacity_bytes)
    except Exception:
        cap = 128 * 1024 * 1024
    return max(32 * 1024 * 1024, min((cap * 3) // 4, 100 * 1024 * 1024))


_VMEM_LIMIT = _vmem_limit_bytes()


# ------------------------------ matmul kernels --------------------------------

def _mm_kernel(a_ref, b_ref, o_ref, acc_ref):
    @pl.when(pl.program_id(2) == 0)
    def _():
        acc_ref[...] = jnp.zeros_like(acc_ref)

    acc_ref[...] += jnp.dot(a_ref[...], b_ref[...],
                            preferred_element_type=jnp.float32)

    @pl.when(pl.program_id(2) == pl.num_programs(2) - 1)
    def _():
        o_ref[...] = acc_ref[...].astype(o_ref.dtype)


def _mm_stats_kernel(a_ref, b_ref, o_ref, s1_ref, s2_ref, acc_ref):
    @pl.when(pl.program_id(2) == 0)
    def _():
        acc_ref[...] = jnp.zeros_like(acc_ref)

    acc_ref[...] += jnp.dot(a_ref[...], b_ref[...],
                            preferred_element_type=jnp.float32)

    @pl.when(pl.program_id(2) == pl.num_programs(2) - 1)
    def _():
        acc = acc_ref[...]
        o_ref[...] = acc.astype(o_ref.dtype)
        # per-channel partial sums for BatchNorm (zero-padded rows contribute 0)
        s1_ref[0] = jnp.sum(acc, axis=0, keepdims=True)
        s2_ref[0] = jnp.sum(acc * acc, axis=0, keepdims=True)


def fused_matmul(a, b_padded, n_true, *, with_stats=False, out_dtype=jnp.float32):
    """a: (M, K) (cast to bf16); b_padded: (Kp, Np) bf16 pre-packed weight.

    Returns out[:M, :n_true] and, if with_stats, per-channel (sum, sum_sq) of the
    M valid rows accumulated inside the matmul epilogue from the f32 accumulator."""
    M, K = a.shape
    (Mp, tm), (Kp, tk), (Np, tn) = _mm_dims(M, K, n_true)
    assert b_padded.shape == (Kp, Np), (b_padded.shape, (Kp, Np))

    a = a.astype(jnp.bfloat16)
    if (Mp, Kp) != (M, K):
        a = jnp.pad(a, ((0, Mp - M), (0, Kp - K)))
    gm, gn, gk = Mp // tm, Np // tn, Kp // tk

    out_bytes = jnp.dtype(out_dtype).itemsize
    cost = pl.CostEstimate(
        flops=2 * Mp * Np * Kp,
        transcendentals=0,
        bytes_accessed=Mp * Kp * 2 + Kp * Np * 2 + Mp * Np * out_bytes)

    out_shapes = [jax.ShapeDtypeStruct((Mp, Np), out_dtype)]
    out_specs = [pl.BlockSpec((tm, tn), lambda i, j, k: (i, j))]
    if with_stats:
        out_shapes += [jax.ShapeDtypeStruct((gm, 1, Np), jnp.float32)] * 2
        out_specs += [pl.BlockSpec((1, 1, tn), lambda i, j, k: (i, 0, j))] * 2
        kernel = _mm_stats_kernel
    else:
        kernel = _mm_kernel

    res = pl.pallas_call(
        kernel,
        out_shape=tuple(out_shapes),
        grid_spec=pltpu.PrefetchScalarGridSpec(
            num_scalar_prefetch=0,
            grid=(gm, gn, gk),
            in_specs=[pl.BlockSpec((tm, tk), lambda i, j, k: (i, k)),
                      pl.BlockSpec((tk, tn), lambda i, j, k: (k, j))],
            out_specs=tuple(out_specs),
            scratch_shapes=[pltpu.VMEM((tm, tn), jnp.float32)],
        ),
        compiler_params=pltpu.CompilerParams(
            dimension_semantics=("parallel", "parallel", "arbitrary"),
            vmem_limit_bytes=_VMEM_LIMIT),
        cost_estimate=cost,
    )(a, b_padded)

    if with_stats:
        out, s1, s2 = res
        return (out[:M, :n_true],
                s1[:, 0, :n_true].sum(axis=0),
                s2[:, 0, :n_true].sum(axis=0))
    return res[0][:M, :n_true]


# ---------------------- fused direct conv (3x3, stride 1) ----------------------

def _direct_conv_kernel(x_ref, w_ref, o_ref, s1_ref, s2_ref, *,
                        kh, kw, cin, ho, wo, wp, rc):
    """Stride-1 direct convolution of one image, BN stats fused in the epilogue.

    x_ref: (1, Hp*Wp, Cin)  spatially padded image, H/W flattened row-major.
    w_ref: (kh*kw*Cin, Np)  packed weight (row order: kh, kw, cin).
    o_ref: (1, ho, wo, Np); s1_ref / s2_ref: (1, 1, Np).

    Output flat index p = r*Wp + w consumes input pixels p + di*Wp + dj, so every
    tap's LHS is a *contiguous* window of the flattened image -> plain 2-D MXU
    matmuls with no im2col materialisation in HBM.
    """
    np_ = o_ref.shape[-1]
    # One aligned whole-block load; taps slice this f32 value at static offsets
    # (keeps all relayouts on the well-supported 32-bit path).
    # TODO(synk): direct bf16 tap loads from the ref would cut the upcast VPU work.
    xf = x_ref[0].astype(jnp.float32)
    s1 = jnp.zeros((1, np_), jnp.float32)
    s2 = jnp.zeros((1, np_), jnp.float32)
    r0 = 0
    while r0 < ho:
        rows = min(rc, ho - r0)
        run = (rows - 1) * wp + wo            # covers exactly the valid pixels
        acc = None
        for di in range(kh):
            for dj in range(kw):
                start = (r0 + di) * wp + dj
                a = xf[start:start + run, :].astype(jnp.bfloat16)
                w = w_ref[(di * kw + dj) * cin:(di * kw + dj + 1) * cin, :]
                d = jnp.dot(a, w, preferred_element_type=jnp.float32)
                acc = d if acc is None else acc + d
        for r in range(rows):                 # drop the Wp-stride gap columns
            row = acc[r * wp:r * wp + wo, :]
            o_ref[0, r0 + r] = row.astype(o_ref.dtype)
            s1 = s1 + jnp.sum(row, axis=0, keepdims=True)
            s2 = s2 + jnp.sum(row * row, axis=0, keepdims=True)
        r0 += rows
    s1_ref[0] = s1
    s2_ref[0] = s2


def _conv2d_direct_s1(x, blk, *, out_dtype=jnp.bfloat16):
    """Fused stride-1 conv + BN-stat epilogue; x: (N, H, W, C) bf16 NHWC."""
    N, H, W, C = x.shape
    kh, kw, p, cout = blk['kh'], blk['kw'], blk['pad'], blk['cout']
    Ho, Wo = H + 2 * p - kh + 1, W + 2 * p - kw + 1
    Hp, Wp = H + 2 * p, W + 2 * p
    xpad = x if p == 0 else jnp.pad(x, ((0, 0), (p, p), (p, p), (0, 0)))
    x2 = xpad.reshape(N, Hp * Wp, C)          # free, row-major flatten

    Kp, Np = blk['wmat'].shape
    assert Kp == kh * kw * C, (Kp, kh * kw * C)
    rc = max(1, 512 // Wp)                    # bound the per-chunk f32 accumulator

    kernel = functools.partial(_direct_conv_kernel, kh=kh, kw=kw, cin=C,
                               ho=Ho, wo=Wo, wp=Wp, rc=rc)
    cost = pl.CostEstimate(
        flops=2 * N * Ho * Wo * Kp * Np,
        transcendentals=0,
        bytes_accessed=(x2.size * 2 + Kp * Np * 2
                        + N * Ho * Wo * Np * jnp.dtype(out_dtype).itemsize))

    out, s1, s2 = pl.pallas_call(
        kernel,
        out_shape=(jax.ShapeDtypeStruct((N, Ho, Wo, Np), out_dtype),
                   jax.ShapeDtypeStruct((N, 1, Np), jnp.float32),
                   jax.ShapeDtypeStruct((N, 1, Np), jnp.float32)),
        grid_spec=pltpu.PrefetchScalarGridSpec(
            num_scalar_prefetch=0,
            grid=(N,),
            in_specs=[pl.BlockSpec((1, Hp * Wp, C), lambda n: (n, 0, 0)),
                      pl.BlockSpec((Kp, Np), lambda n: (0, 0))],
            out_specs=(pl.BlockSpec((1, Ho, Wo, Np), lambda n: (n, 0, 0, 0)),
                       pl.BlockSpec((1, 1, Np), lambda n: (n, 0, 0)),
                       pl.BlockSpec((1, 1, Np), lambda n: (n, 0, 0))),
        ),
        compiler_params=pltpu.CompilerParams(
            dimension_semantics=("parallel",),
            vmem_limit_bytes=_VMEM_LIMIT),
        cost_estimate=cost,
    )(x2, blk['wmat'])

    return (out[..., :cout],
            s1[:, 0, :cout].sum(axis=0),
            s2[:, 0, :cout].sum(axis=0))


# ------------------------------ fused elementwise ------------------------------

def _bn_act_kernel(x_ref, scale_ref, shift_ref, o_ref, *, relu):
    y = x_ref[...].astype(jnp.float32) * scale_ref[...] + shift_ref[...]
    if relu:
        y = jnp.maximum(y, 0.0)
    o_ref[...] = y.astype(o_ref.dtype)


def _bn_add_relu_kernel(x_ref, res_ref, scale_ref, shift_ref, o_ref):
    y = (x_ref[...].astype(jnp.float32) * scale_ref[...] + shift_ref[...]
         + res_ref[...].astype(jnp.float32))
    o_ref[...] = jnp.maximum(y, 0.0).astype(o_ref.dtype)


def _row_tile(R):
    """Row tiling for elementwise kernels; never degenerates to tiny tiles."""
    Rp = _round_up(R, 8)
    if Rp <= 512:
        return Rp, Rp
    return _round_up(R, 512), 512


def _apply_bn(x4d, scale, shift, *, relu, residual=None, out_dtype=jnp.bfloat16):
    """y = relu(x*scale + shift [+ residual]); row-tiled; lane-dense layout."""
    N, H, W, C = x4d.shape
    M = N * H * W
    x2 = x4d.reshape(M, C)
    res2 = None if residual is None else residual.reshape(M, C)

    # keep the lane (last) dim >= 128 where channels are narrow (stem C=64)
    fold = 1
    if C < 128:
        f = 128 // C
        if f > 1 and M % f == 0:
            fold = f
    L, R = C * fold, M // fold
    x2 = x2.reshape(R, L)
    if res2 is not None:
        res2 = res2.reshape(R, L)
    sc = jnp.tile(scale, fold).reshape(1, L).astype(jnp.float32)
    sh = jnp.tile(shift, fold).reshape(1, L).astype(jnp.float32)

    Rp, tr = _row_tile(R)
    if Rp != R:
        x2 = jnp.pad(x2, ((0, Rp - R), (0, 0)))
        if res2 is not None:
            res2 = jnp.pad(res2, ((0, Rp - R), (0, 0)))

    row_spec = pl.BlockSpec((tr, L), lambda i: (i, 0))
    vec_spec = pl.BlockSpec((1, L), lambda i: (0, 0))
    if res2 is None:
        kern = functools.partial(_bn_act_kernel, relu=relu)
        in_specs = [row_spec, vec_spec, vec_spec]
        args = (x2, sc, sh)
    else:
        kern = _bn_add_relu_kernel
        in_specs = [row_spec, row_spec, vec_spec, vec_spec]
        args = (x2, res2, sc, sh)

    out = pl.pallas_call(
        kern,
        out_shape=jax.ShapeDtypeStruct((Rp, L), out_dtype),
        grid_spec=pltpu.PrefetchScalarGridSpec(
            num_scalar_prefetch=0,
            grid=(Rp // tr,),
            in_specs=in_specs,
            out_specs=row_spec,
        ),
        compiler_params=pltpu.CompilerParams(
            dimension_semantics=("parallel",)),
    )(*args)
    if Rp != R:
        out = out[:R]
    return out.reshape(N, H, W, C)


def _bn_scale_shift(s1, s2, count, eps=1e-5):
    """BatchNorm2d(track_running_stats=False, gamma=1, beta=0) from sum / sum-of-sq."""
    mean = s1 / count
    var = jnp.maximum(s2 / count - mean * mean, 0.0)   # biased variance (PyTorch norm)
    scale = jax.lax.rsqrt(var + eps)
    return scale, -mean * scale


# ----------------------------------- maxpool -----------------------------------

def maxpool_3x3_s2_p1(x):
    """MaxPool2d(kernel=3, stride=2, padding=1) on NHWC as one fused Pallas kernel."""
    # TODO(synk): bf16 max / lane-folded layout are possible micro-opts (v6e/v7x);
    # kept on the proven f32 path since this one-off kernel is a negligible cost.
    N, H, W, C = x.shape
    Ho = (H - 1) // 2 + 1
    Wo = (W - 1) // 2 + 1
    xp = jnp.pad(x, ((0, 0), (1, 1), (1, 1), (0, 0)), constant_values=-jnp.inf)
    # even/odd phase split (total bytes == input bytes, no 9x blowup)
    phases = []
    for p in range(2):
        for q in range(2):
            ph = xp[:, p::2, q::2, :]
            ph = jnp.pad(ph, ((0, 0),
                              (0, Ho + 1 - ph.shape[1]),
                              (0, Wo + 1 - ph.shape[2]),
                              (0, 0)),
                         constant_values=-jnp.inf)
            phases.append(ph)

    def kernel(p00_ref, p01_ref, p10_ref, p11_ref, o_ref):
        p00 = p00_ref[0].astype(jnp.float32)
        p01 = p01_ref[0].astype(jnp.float32)
        p10 = p10_ref[0].astype(jnp.float32)
        p11 = p11_ref[0].astype(jnp.float32)
        taps = [(p00, 0, 0), (p01, 0, 0), (p00, 0, 1),
                (p10, 0, 0), (p11, 0, 0), (p10, 0, 1),
                (p00, 1, 0), (p01, 1, 0), (p00, 1, 1)]
        m = None
        for arr, da, db in taps:
            v = arr[da:da + Ho, db:db + Wo, :]
            m = v if m is None else jnp.maximum(m, v)
        o_ref[0] = m.astype(o_ref.dtype)

    phase_spec = pl.BlockSpec((1, Ho + 1, Wo + 1, C), lambda n: (n, 0, 0, 0))
    return pl.pallas_call(
        kernel,
        out_shape=jax.ShapeDtypeStruct((N, Ho, Wo, C), x.dtype),
        grid_spec=pltpu.PrefetchScalarGridSpec(
            num_scalar_prefetch=0,
            grid=(N,),
            in_specs=[phase_spec] * 4,
            out_specs=pl.BlockSpec((1, Ho, Wo, C), lambda n: (n, 0, 0, 0)),
        ),
        compiler_params=pltpu.CompilerParams(
            dimension_semantics=("parallel",)),
    )(*phases)


# --------------------------------- convolution ---------------------------------

def _conv2d_im2col(x, blk, *, with_stats, out_dtype):
    """im2col + MXU matmul path (stem 7x7, stride-2 3x3, 1x1 convs)."""
    N, H, W, C = x.shape
    kh, kw, s, p, cout = blk['kh'], blk['kw'], blk['stride'], blk['pad'], blk['cout']
    Ho = (H + 2 * p - kh) // s + 1
    Wo = (W + 2 * p - kw) // s + 1
    if p:
        x = jnp.pad(x, ((0, 0), (p, p), (p, p), (0, 0)))
    if kh == 1 and kw == 1:
        patches = x[:, ::s, ::s, :].reshape(N * Ho * Wo, C)
    else:
        cols = []
        for i in range(kh):
            for j in range(kw):
                cols.append(x[:, i:i + s * (Ho - 1) + 1:s,
                                j:j + s * (Wo - 1) + 1:s, :])
        patches = jnp.stack(cols, axis=3).reshape(N * Ho * Wo, kh * kw * C)

    res = fused_matmul(patches, blk['wmat'], cout,
                       with_stats=with_stats, out_dtype=out_dtype)
    if with_stats:
        out, s1, s2 = res
        return out.reshape(N, Ho, Wo, cout), s1, s2
    return res.reshape(N, Ho, Wo, cout)


def conv2d(x, blk, *, with_stats=False, out_dtype=jnp.bfloat16):
    """x: NHWC bf16 activations; blk: packed conv params. Output dtype bf16 by default."""
    if blk['direct']:
        out, s1, s2 = _conv2d_direct_s1(x, blk, out_dtype=out_dtype)
        return (out, s1, s2) if with_stats else out
    return _conv2d_im2col(x, blk, with_stats=with_stats, out_dtype=out_dtype)


# --------------------------------- parameters ----------------------------------

def _kaiming_conv(key, cout, cin, kh, kw):
    fan_out = cout * kh * kw                      # mode='fan_out', relu gain
    std = (2.0 / fan_out) ** 0.5
    return std * jax.random.normal(key, (cout, cin, kh, kw), jnp.float32)


def _pack_weight(w, *, direct):
    """Torch-layout (Cout, Cin, kh, kw) -> bf16 (K[p], Np) matmul operand."""
    cout, cin, kh, kw = w.shape
    wmat = jnp.transpose(w, (2, 3, 1, 0)).reshape(kh * kw * cin, cout)
    K, N = wmat.shape
    (_, _), (Kp, _), (Np, _) = _mm_dims(1, K, N)
    if direct:
        Kp = K                    # direct kernel slices taps at Cin granularity
    return jnp.pad(wmat, ((0, Kp - K), (0, Np - N))).astype(jnp.bfloat16)


def _conv_entry(key, cout, cin, kh, kw, stride, pad):
    w = _kaiming_conv(key, cout, cin, kh, kw)
    direct = (stride == 1 and kh * kw > 1)        # fused direct-conv path
    return {'wmat': _pack_weight(w, direct=direct), 'kh': kh, 'kw': kw,
            'stride': stride, 'pad': pad, 'cout': cout, 'cin': cin,
            'direct': direct}


def init_params(key, layers=(1, 1, 1, 1), num_classes=10, in_chs=3):
    keys = iter(jax.random.split(key, 256))
    params = {'conv1': _conv_entry(next(keys), 64, in_chs, 7, 7, stride=2, pad=3)}
    inplanes = 64
    wid_mult, out_chs = 2, 512
    widths = [64 * wid_mult, 128 * wid_mult, 256 * wid_mult, out_chs]
    strides = [1, 2, 2, 2]
    layer_params = []
    for planes, nblocks, stride in zip(widths, layers, strides):
        blocks = []
        for bi in range(nblocks):
            s = stride if bi == 0 else 1
            blk = {
                'conv1': _conv_entry(next(keys), planes, inplanes, 3, 3, stride=s, pad=1),
                'conv2': _conv_entry(next(keys), planes, planes, 3, 3, stride=1, pad=1),
            }
            if s != 1 or inplanes != planes:
                # TODO(synk): shortcut is a bare 1x1 ConvLayer (no norm), per _make_layer.
                blk['down'] = _conv_entry(next(keys), planes, inplanes, 1, 1, stride=s, pad=0)
            blocks.append(blk)
            inplanes = planes
        layer_params.append(blocks)
    params['layers'] = layer_params

    bound = 1.0 / (out_chs ** 0.5)                # default nn.Linear init
    fc_w = jax.random.uniform(next(keys), (num_classes, out_chs),
                              jnp.float32, -bound, bound)
    params['fc_b'] = jax.random.uniform(next(keys), (num_classes,),
                                        jnp.float32, -bound, bound)
    K, N = out_chs, num_classes
    (_, _), (Kp, _), (Np, _) = _mm_dims(1, K, N)
    params['fc_wmat'] = jnp.pad(fc_w.T, ((0, Kp - K), (0, Np - N))).astype(jnp.bfloat16)
    params['num_classes'] = num_classes
    return params


# ----------------------------------- forward -----------------------------------

def resnet_forward(params, x_nchw):
    x = jnp.transpose(x_nchw, (0, 2, 3, 1)).astype(jnp.bfloat16)   # NHWC, bf16 acts

    # stem: conv7x7/2 (BN stats fused in matmul epilogue) -> BN+ReLU -> maxpool3x3/2
    y, s1, s2 = conv2d(x, params['conv1'], with_stats=True)
    cnt = y.shape[0] * y.shape[1] * y.shape[2]
    scale, shift = _bn_scale_shift(s1, s2, cnt)
    x = _apply_bn(y, scale, shift, relu=True)
    x = maxpool_3x3_s2_p1(x)

    # residual stages (assumed BasicBlock, see header TODO)
    for blocks in params['layers']:
        for blk in blocks:
            identity = x
            y1, a1, a2 = conv2d(x, blk['conv1'], with_stats=True)
            c1 = y1.shape[0] * y1.shape[1] * y1.shape[2]
            sc1, sh1 = _bn_scale_shift(a1, a2, c1)
            h = _apply_bn(y1, sc1, sh1, relu=True)

            y2, b1, b2 = conv2d(h, blk['conv2'], with_stats=True)
            c2 = y2.shape[0] * y2.shape[1] * y2.shape[2]
            sc2, sh2 = _bn_scale_shift(b1, b2, c2)

            if 'down' in blk:
                identity = conv2d(x, blk['down'], with_stats=False)
            # fused: BN-apply + residual add + ReLU in one pass (bf16 streams)
            x = _apply_bn(y2, sc2, sh2, relu=True, residual=identity)

    # AdaptiveAvgPool2d((1,1)) + flatten
    x = jnp.mean(x.astype(jnp.float32), axis=(1, 2))               # (N, 512)
    # TODO(synk): nn.Dropout(p=0.2) is identity at inference; no op emitted.
    logits = fused_matmul(x, params['fc_wmat'], params['num_classes'])
    return logits + params['fc_b'][None, :]


if __name__ == "__main__":
    key = jax.random.PRNGKey(0)
    k_params, k_x = jax.random.split(key)
    params = init_params(k_params, layers=(1, 1, 1, 1), num_classes=10, in_chs=3)
    x = jax.random.normal(k_x, (2, 3, 16, 16), jnp.float32)        # NCHW input
    logits = resnet_forward(params, x)
    logits = jax.block_until_ready(logits)
    assert logits.shape == (2, 10)
    assert bool(jnp.all(jnp.isfinite(logits)))
    print("KERNEL_OK")
</pallas_src>

<mosaic_0001>
module attributes {stable_mosaic.version = 11 : i64} {
  func.func @_mm_stats_kernel(%arg0: i32, %arg1: i32, %arg2: i32, %arg3: memref<128x256xbf16, #tpu.memory_space<vmem>>, %arg4: memref<256x128xbf16, #tpu.memory_space<vmem>>, %arg5: memref<128x128xbf16, #tpu.memory_space<vmem>>, %arg6: memref<1x1x128xf32, #tpu.memory_space<vmem>>, %arg7: memref<1x1x128xf32, #tpu.memory_space<vmem>>, %arg8: memref<128x128xf32, #tpu.memory_space<vmem>>) attributes {dimension_semantics = [#tpu.dimension_semantics<parallel>, #tpu.dimension_semantics<parallel>, #tpu.dimension_semantics<arbitrary>], iteration_bounds = array<i64: 1, 1, 1>, scalar_prefetch = 0 : i64, scratch_operands = 1 : i64, tpu.core_type = #tpu.core_type<tc>, window_params = [{transform_indices = @transform_0, window_bounds = array<i64: 128, 256>}, {transform_indices = @transform_1, window_bounds = array<i64: 256, 128>}, {transform_indices = @transform_2, window_bounds = array<i64: 128, 128>}, {transform_indices = @transform_3, window_bounds = array<i64: 1, 1, 128>}, {transform_indices = @transform_4, window_bounds = array<i64: 1, 1, 128>}]} {
    %c0_i32 = arith.constant 0 : i32
    %0 = arith.cmpi eq, %arg2, %c0_i32 : i32
    %1 = arith.extui %0 : i1 to i32
    %c0_i32_0 = arith.constant 0 : i32
    %2 = arith.cmpi ne, %1, %c0_i32_0 : i32
    scf.if %2 {
      %cst_10 = arith.constant 0.000000e+00 : f32
      %12 = vector.broadcast %cst_10 : f32 to vector<128x128xf32>
      %c0_11 = arith.constant 0 : index
      %c0_12 = arith.constant 0 : index
      %13 = vector.load %arg8[%c0_11, %c0_12] : memref<128x128xf32, #tpu.memory_space<vmem>>, vector<128x128xf32>
      tpu.vector_store %arg8[%c0_11, %c0_12], %12 {strides = array<i32>} : memref<128x128xf32, #tpu.memory_space<vmem>>, vector<128x128xf32>,
    } else {
    }
    %c0 = arith.constant 0 : index
    %c0_1 = arith.constant 0 : index
    %3 = vector.load %arg8[%c0, %c0_1] : memref<128x128xf32, #tpu.memory_space<vmem>>, vector<128x128xf32>
    %c0_2 = arith.constant 0 : index
    %c0_3 = arith.constant 0 : index
    %4 = vector.load %arg3[%c0_2, %c0_3] : memref<128x256xbf16, #tpu.memory_space<vmem>>, vector<128x256xbf16>
    %c0_4 = arith.constant 0 : index
    %c0_5 = arith.constant 0 : index
    %5 = vector.load %arg4[%c0_4, %c0_5] : memref<256x128xbf16, #tpu.memory_space<vmem>>, vector<256x128xbf16>
    %cst = arith.constant dense<0.000000e+00> : vector<128x128xf32>
    %6 = tpu.matmul %4, %5, %cst {dimension_numbers = #tpu.dot_dimension_numbers<[1], [0], [0], [1], [0, 0, 1, 1], [], []>} : vector<128x256xbf16>, vector<256x128xbf16>, vector<128x128xf32> -> vector<128x128xf32>
    %7 = arith.addf %3, %6 : vector<128x128xf32>
    %c0_6 = arith.constant 0 : index
    %c0_7 = arith.constant 0 : index
    %8 = vector.load %arg8[%c0_6, %c0_7] : memref<128x128xf32, #tpu.memory_space<vmem>>, vector<128x128xf32>
    tpu.vector_store %arg8[%c0_6, %c0_7], %7 {strides = array<i32>} : memref<128x128xf32, #tpu.memory_space<vmem>>, vector<128x128xf32>,
    %c0_i32_8 = arith.constant 0 : i32
    %9 = arith.cmpi eq, %arg2, %c0_i32_8 : i32
    %10 = arith.extui %9 : i1 to i32
    %c0_i32_9 = arith.constant 0 : i32
    %11 = arith.cmpi ne, %10, %c0_i32_9 : i32
    scf.if %11 {
      %c0_10 = arith.constant 0 : index
      %c0_11 = arith.constant 0 : index
      %12 = vector.load %arg8[%c0_10, %c0_11] : memref<128x128xf32, #tpu.memory_space<vmem>>, vector<128x128xf32>
      %13 = arith.truncf %12 : vector<128x128xf32> to vector<128x128xbf16>
      %c0_12 = arith.constant 0 : index
      %c0_13 = arith.constant 0 : index
      %14 = vector.load %arg5[%c0_12, %c0_13] : memref<128x128xbf16, #tpu.memory_space<vmem>>, vector<128x128xbf16>
      tpu.vector_store %arg5[%c0_12, %c0_13], %13 {strides = array<i32>} : memref<128x128xbf16, #tpu.memory_space<vmem>>, vector<128x128xbf16>,
      %cst_14 = arith.constant dense<0.000000e+00> : vector<128xf32>
      %15 = vector.multi_reduction <add>, %12, %cst_14 [0] : vector<128x128xf32> to vector<128xf32>
      %16 = vector.shape_cast %15 : vector<128xf32> to vector<1x128xf32>
      %c0_15 = arith.constant 0 : index
      %c0_16 = arith.constant 0 : index
      %c0_17 = arith.constant 0 : index
      %17 = vector.load %arg6[%c0_15, %c0_16, %c0_17] : memref<1x1x128xf32, #tpu.memory_space<vmem>>, vector<1x1x128xf32>
      %18 = vector.shape_cast %17 : vector<1x1x128xf32> to vector<1x128xf32>
      %19 = vector.shape_cast %16 : vector<1x128xf32> to vector<1x1x128xf32>
      tpu.vector_store %arg6[%c0_15, %c0_16, %c0_17], %19 {strides = array<i32>} : memref<1x1x128xf32, #tpu.memory_space<vmem>>, vector<1x1x128xf32>,
      %20 = arith.mulf %12, %12 : vector<128x128xf32>
      %cst_18 = arith.constant dense<0.000000e+00> : vector<128xf32>
      %21 = vector.multi_reduction <add>, %20, %cst_18 [0] : vector<128x128xf32> to vector<128xf32>
      %22 = vector.shape_cast %21 : vector<128xf32> to vector<1x128xf32>
      %c0_19 = arith.constant 0 : index
      %c0_20 = arith.constant 0 : index
      %c0_21 = arith.constant 0 : index
      %23 = vector.load %arg7[%c0_19, %c0_20, %c0_21] : memref<1x1x128xf32, #tpu.memory_space<vmem>>, vector<1x1x128xf32>
      %24 = vector.shape_cast %23 : vector<1x1x128xf32> to vector<1x128xf32>
      %25 = vector.shape_cast %22 : vector<1x128xf32> to vector<1x1x128xf32>
      tpu.vector_store %arg7[%c0_19, %c0_20, %c0_21], %25 {strides = array<i32>} : memref<1x1x128xf32, #tpu.memory_space<vmem>>, vector<1x1x128xf32>,
    } else {
    }
    return
  }
  func.func @transform_0(%arg0: i32, %arg1: i32, %arg2: i32) -> (i32, i32) {
    %c0_i32 = arith.constant 0 : i32
    return %arg0, %arg2 : i32, i32
  }
  func.func @transform_1(%arg0: i32, %arg1: i32, %arg2: i32) -> (i32, i32) {
    %c0_i32 = arith.constant 0 : i32
    return %arg2, %arg1 : i32, i32
  }
  func.func @transform_2(%arg0: i32, %arg1: i32, %arg2: i32) -> (i32, i32) {
    %c0_i32 = arith.constant 0 : i32
    return %arg0, %arg1 : i32, i32
  }
  func.func @transform_3(%arg0: i32, %arg1: i32, %arg2: i32) -> (i32, i32, i32) {
    %c0_i32 = arith.constant 0 : i32
    %c0_i32_0 = arith.constant 0 : i32
    return %arg0, %c0_i32, %arg1 : i32, i32, i32
  }
  func.func @transform_4(%arg0: i32, %arg1: i32, %arg2: i32) -> (i32, i32, i32) {
    %c0_i32 = arith.constant 0 : i32
    %c0_i32_0 = arith.constant 0 : i32
    return %arg0, %c0_i32, %arg1 : i32, i32, i32
  }
}

</mosaic_0001>

<bundles_post_ra>
// kernel: tpu_custom_call.1
= control target key start
LH: loop header
LB: loop body
LE: loop exit
PB: predicated region body
PF: predicated region fallthrough
CT: control target
= control target key end

     0   :  { %10 = vsyncpa [#allocation4], 0  ;;  %s1071_s0 = inlined_call_operand.hbm [shape: bf16[128,256], index: 0, kind: input, shape index: {}]   ;;  %s1072_s1 = inlined_call_operand.hbm [shape: bf16[256,128], index: 1, kind: input, shape index: {}]   ;;  %s1073_s2 = inlined_call_operand.hbm [shape: bf16[128,128], index: 2, kind: output, shape index: {0}]   ;;  %s1074_s3 = inlined_call_operand.hbm [shape: f32[1,1,128], index: 3, kind: output, shape index: {1}]   ;;  %s1075_s4 = inlined_call_operand.hbm [shape: f32[1,1,128], index: 4, kind: output, shape index: {2}]  }
   0x1   :  { %11 = vsyncpa [#allocation7], 0 }
   0x2   :  { %12 = vsyncpa [#allocation5], 0 }
   0x3   :  { %13 = vsyncpa [#allocation10], 0  ;;  %s986_s15 = smov [#allocation3]  }
   0x4   :  { %s19_s16 = sshll.u32 %s986_s15, 4  ;;  %s20_s16 = int_to_ptr.vmem [resolvable:$true] %s19_s16 }
   0x5   :  { %s886_s17 = scalar_lea.vmem %s20_s16, 2048  ;;  %p891_p1 = scmp.lt.s32.totalorder %s20_s16, %s20_s16 }
   0x6   :  { %p887_p0 = scmp.ne.s32.totalorder %s20_s16, %s886_s17  ;;  %p892_p2 = scmp.lt.s32.totalorder %s886_s17, %s886_s17 }
   0x8   :  { %p893_p3 = por %p892_p2, %p891_p1 }
   0xa   :  { %p894_p4 = pnand %p893_p3, %p887_p0 }
   0xc   :  { %897 = shalt.err (!%p894_p4)
}
   0xd   :  { %s987_s18 = smov 128   ;;  %s988_s19 = smov 8  }
   0xe   :  { %25 = dma.hbm_to_vmem [thread:$0]  %s1071_s0, 2048, %s20_s16, [#allocation4], %s987_s18, %s987_s18, %s988_s19  }
   0xf   :  { %s989_s22 = smov [#allocation6]  }
  0x10   :  { %s31_s23 = sshll.u32 %s989_s22, 4  ;;  %s32_s23 = int_to_ptr.vmem [resolvable:$true] %s31_s23 }
  0x11   :  { %s906_s24 = scalar_lea.vmem %s32_s23, 2048  ;;  %p911_p6 = scmp.lt.s32.totalorder %s32_s23, %s32_s23 }
  0x12   :  { %p907_p5 = scmp.ne.s32.totalorder %s32_s23, %s906_s24  ;;  %p912_p7 = scmp.lt.s32.totalorder %s906_s24, %s906_s24 }
  0x14   :  { %p913_p8 = por %p912_p7, %p911_p6 }
  0x16   :  { %p914_p9 = pnand %p913_p8, %p907_p5 }
  0x18   :  { %917 = shalt.err (!%p914_p9)
}
  0x19   :  { %s990_s25 = smov 64   ;;  %s991_s26 = smov 4  }
  0x1a   :  { %37 = dma.hbm_to_vmem [thread:$0]  %s1072_s1, 2048, %s32_s23, [#allocation7], %s990_s25, %s990_s25, %s991_s26  }
  0x1b   :  { %978 = dma.done.wait [#allocation4], 2048  }
  0x1c   :  { %979 = vsyncadd [#allocation4], 4294965248 }
  0x1d   :  { %980 = dma.done.wait [#allocation7], 2048  }
  0x1e   :  { %981 = vsyncadd [#allocation7], 4294965248  ;;  %v838_v0 = vld [vmem:[#allocation6 + $0x78] sm:$0xff]   ;;  %v840_v2 = vld [vmem:[#allocation6 + $0x70] sm:$0xff]   ;;  %s992_s0 = smov [#allocation8]  }
  0x1f   :  { %v839_v1 = vld [vmem:[#allocation6 + $0x38] sm:$0xff]   ;;  %749 = vmatprep.subr.bf16.mxu0 %v838_v0  ;;  %813 = vmatprep.subr.bf16.mxu1 %v838_v0  ;;  %v841_v3 = vld [vmem:[#allocation6 + $0x30] sm:$0xff]   ;;  %v842_v4 = vld [vmem:[#allocation6 + $0x68] sm:$0xff]   ;;  %s598_s1 = sshll.u32 %s992_s0, 4  ;;  %s599_s1 = int_to_ptr.vmem [resolvable:$true] %s598_s1 }
  0x20   :  { %750 = vmatpush3.bf16.msra.mxu0 %v839_v1  ;;  %821 = vmatpush3.bf16.msra.mxu1 %v839_v1  ;;  %v843_v5 = vld [vmem:[#allocation6 + $0x28] sm:$0xff]   ;;  %v844_v6 = vld [vmem:[#allocation6 + $0x60] sm:$0xff]   ;;  %v846_v8 = vld [vmem:[#allocation6 + $0x58] sm:$0xff]   ;;  %s918_s29 = scalar_lea.vmem %s599_s1, 1024  ;;  %p923_p11 = scmp.lt.s32.totalorder %s599_s1, %s599_s1 }
  0x21   :  { %751 = vmatprep.subr.bf16.mxu0 %v840_v2  ;;  %814 = vmatprep.subr.bf16.mxu1 %v840_v2  ;;  %v845_v7 = vld [vmem:[#allocation6 + $0x20] sm:$0xff]   ;;  %v847_v9 = vld [vmem:[#allocation6 + $0x18] sm:$0xff]   ;;  %v848_v10 = vld [vmem:[#allocation6 + $0x50] sm:$0xff]   ;;  %p919_p10 = scmp.ne.s32.totalorder %s599_s1, %s918_s29  ;;  %p924_p12 = scmp.lt.s32.totalorder %s918_s29, %s918_s29 }
  0x22   :  { %v856_v11 = vld [vmem:[#allocation3 + $0x4] ss:$8 sps:$4 sm:$0xff]   ;;  %v849_v12 = vld [vmem:[#allocation6 + $0x10] sm:$0xff]   ;;  %v854_v18 = vld [vmem:[#allocation3] ss:$8 sps:$4 sm:$0xff]  }
  0x23   :  { %v862_v13 = vld [vmem:[#allocation3 + $0x44] ss:$8 sps:$4 sm:$0xff]   ;;  %337 = vmatprep.mubr.bf16.mxu0 %v856_v11  ;;  %v860_v19 = vld [vmem:[#allocation3 + $0x40] ss:$8 sps:$4 sm:$0xff]   ;;  %v857_v20 = vld [vmem:[#allocation3 + $0x14] ss:$8 sps:$4 sm:$0xff]   ;;  %p925_p13 = por %p924_p12, %p923_p11 }
  0x24   :  { %752 = vmatpush3.bf16.msra.mxu0 %v841_v3  ;;  %822 = vmatpush3.bf16.msra.mxu1 %v841_v3  ;;  %v850_v14 = vld [vmem:[#allocation6 + $0x48] sm:$0xff]   ;;  %v852_v16 = vld [vmem:[#allocation6 + $0x40] sm:$0xff]   ;;  %v866_v21 = vld [vmem:[#allocation3 + $0x54] ss:$8 sps:$4 sm:$0xff]  }
  0x25   :  { %753 = vmatprep.subr.bf16.mxu0 %v842_v4  ;;  %815 = vmatprep.subr.bf16.mxu1 %v842_v4  ;;  %v851_v15 = vld [vmem:[#allocation6 + $0x8] sm:$0xff]   ;;  %v853_v17 = vld [vmem:[#allocation6] sm:$0xff]   ;;  %v859_v22 = vld [vmem:[#allocation3 + $0x10] ss:$8 sps:$4 sm:$0xff]   ;;  %p926_p0 = pnand %p925_p13, %p919_p10 }
  0x26   :  { %369 = vmatprep.mubr.bf16.mxu1 %v862_v13  ;;  %v868_v23 = vld [vmem:[#allocation3 + $0x50] ss:$8 sps:$4 sm:$0xff]   ;;  %v863_v24 = vld [vmem:[#allocation3 + $0x24] ss:$8 sps:$4 sm:$0xff]   ;;  %v865_v26 = vld [vmem:[#allocation3 + $0x20] ss:$8 sps:$4 sm:$0xff]  }
  0x27   :  { %v872_v25 = vld [vmem:[#allocation3 + $0x64] ss:$8 sps:$4 sm:$0xff]   ;;  %v874_v27 = vld [vmem:[#allocation3 + $0x60] ss:$8 sps:$4 sm:$0xff]   ;;  %v869_v28 = vld [vmem:[#allocation3 + $0x34] ss:$8 sps:$4 sm:$0xff]  }
  0x28   :  { %754 = vmatpush3.bf16.msra.mxu0 %v843_v5  ;;  %823 = vmatpush3.bf16.msra.mxu1 %v843_v5  ;;  %v875_v29 = vld [vmem:[#allocation3 + $0x74] ss:$8 sps:$4 sm:$0xff]   ;;  %v871_v30 = vld [vmem:[#allocation3 + $0x30] ss:$8 sps:$4 sm:$0xff]  }
  0x29   :  { %755 = vmatprep.subr.bf16.mxu0 %v844_v6  ;;  %816 = vmatprep.subr.bf16.mxu1 %v844_v6  ;;  %v877_v31 = vld [vmem:[#allocation3 + $0x70] ss:$8 sps:$4 sm:$0xff]  }
  0x2c   :  { %756 = vmatpush3.bf16.msra.mxu0 %v845_v7  ;;  %824 = vmatpush3.bf16.msra.mxu1 %v845_v7 }
  0x2d   :  { %757 = vmatprep.subr.bf16.mxu0 %v846_v8  ;;  %817 = vmatprep.subr.bf16.mxu1 %v846_v8 }
  0x30   :  { %758 = vmatpush3.bf16.msra.mxu0 %v847_v9  ;;  %825 = vmatpush3.bf16.msra.mxu1 %v847_v9 }
  0x31   :  { %759 = vmatprep.subr.bf16.mxu0 %v848_v10  ;;  %818 = vmatprep.subr.bf16.mxu1 %v848_v10 }
  0x34   :  { %760 = vmatpush3.bf16.msra.mxu0 %v849_v12  ;;  %826 = vmatpush3.bf16.msra.mxu1 %v849_v12 }
  0x35   :  { %761 = vmatprep.subr.bf16.mxu0 %v850_v14  ;;  %819 = vmatprep.subr.bf16.mxu1 %v850_v14 }
  0x38   :  { %762 = vmatpush3.bf16.msra.mxu0 %v851_v15  ;;  %827 = vmatpush3.bf16.msra.mxu1 %v851_v15 }
  0x39   :  { %763 = vmatprep.subr.bf16.mxu0 %v852_v16  ;;  %820 = vmatprep.subr.bf16.mxu1 %v852_v16 }
  0x3c   :  { %764 = vmatpush3.bf16.msra.mxu0 %v853_v17  ;;  %828 = vmatpush3.bf16.msra.mxu1 %v853_v17 }
  0x3f   :  { %338 = vmatmul.mubr.bf16.vlgmr.msra.gmra.mxu0 %v854_v18  ;;  %370 = vmatmul.mubr.bf16.vlgmr.msra.gmra.mxu1 %v860_v19 }
  0x40   :  { %345 = vmatprep.mubr.bf16.mxu0 %v857_v20  ;;  %377 = vmatprep.mubr.bf16.mxu1 %v866_v21 }
  0x47   :  { %346 = vmatmul.mubr.bf16.gmra.mxu0 %v859_v22  ;;  %378 = vmatmul.mubr.bf16.gmra.mxu1 %v868_v23 }
  0x48   :  { %353 = vmatprep.mubr.bf16.mxu0 %v863_v24  ;;  %385 = vmatprep.mubr.bf16.mxu1 %v872_v25 }
  0x4f   :  { %354 = vmatmul.mubr.bf16.gmra.mxu0 %v865_v26  ;;  %386 = vmatmul.mubr.bf16.gmra.mxu1 %v874_v27 }
  0x50   :  { %361 = vmatprep.mubr.bf16.mxu0 %v869_v28  ;;  %393 = vmatprep.mubr.bf16.mxu1 %v875_v29 }
  0x57   :  { %362 = vmatmul.mubr.bf16.gmra.mxu0 %v871_v30  ;;  %394 = vmatmul.mubr.bf16.gmra.mxu1 %v877_v31 }
  0xff   :  { %v765_v32 = vpop.f32.mrf.mxu0  ;;  %v789_v33 = vpop.f32.mrf.mxu1 }
 0x101   :  { %v766_v34 = vpop.f32.mrf.mxu0  ;;  %v790_v35 = vpop.f32.mrf.mxu1 }
 0x102   :  { %v1029_v38 = vadd.f32 %v790_v35, %v789_v33  ;;  %v767_v41 = vadd.f32 %v766_v34, %v765_v32 }
 0x103   :  { %v768_v36 = vpop.f32.mrf.mxu0  ;;  %v792_v37 = vpop.f32.mrf.mxu1 }
 0x104   :  { %v555_v1 = vmul.f32 %v767_v41, %v767_v41 }
 0x105   :  { %v769_v39 = vpop.f32.mrf.mxu0  ;;  %v793_v40 = vpop.f32.mrf.mxu1 }
 0x106   :  { %v770_v42 = vadd.f32 %v769_v39, %v768_v36  ;;  %v1031_v43 = vadd.f32 %v793_v40, %v792_v37 }
 0x107   :  { %v771_v44 = vpop.f32.mrf.mxu0  ;;  %v795_v45 = vpop.f32.mrf.mxu1 }
 0x108   :  { %v705_v46 = vpack.c.bf16 %v770_v42, %v767_v41  ;;  %v725_v47 = vpack.c.bf16 %v1031_v43, %v1029_v38  ;;  %v556_v62 = vmul.f32 %v770_v42, %v770_v42  ;;  %v533_v6 = vadd.f32 %v770_v42, %v767_v41 }
 0x109   :  { %v772_v48 = vpop.f32.mrf.mxu0  ;;  %v796_v49 = vpop.f32.mrf.mxu1 }
 0x10a   :  { %706 = vst [vmem:[#allocation8] sm:$0xff] %v705_v46   ;;  %745 = vst [vmem:[#allocation8 + $0x20] sm:$0xff] %v725_v47   ;;  %v1035_v52 = vadd.f32 %v796_v49, %v795_v45  ;;  %v773_v55 = vadd.f32 %v772_v48, %v771_v44  ;;  %v571_v8 = vadd.f32 %v556_v62, %v555_v1 }
 0x10b   :  { %v774_v50 = vpop.f32.mrf.mxu0  ;;  %v798_v51 = vpop.f32.mrf.mxu1  ;;  %v563_v47 = vmul.f32 %v1029_v38, %v1029_v38 }
 0x10c   :  { %v557_v2 = vmul.f32 %v773_v55, %v773_v55  ;;  %v534_v12 = vadd.f32 %v773_v55, %v533_v6 }
 0x10d   :  { %v775_v53 = vpop.f32.mrf.mxu0  ;;  %v799_v54 = vpop.f32.mrf.mxu1 }
 0x10e   :  { %v776_v56 = vadd.f32 %v775_v53, %v774_v50  ;;  %v1037_v57 = vadd.f32 %v799_v54, %v798_v51  ;;  %v572_v15 = vadd.f32 %v571_v8, %v557_v2 }
 0x10f   :  { %v777_v58 = vpop.f32.mrf.mxu0  ;;  %v801_v59 = vpop.f32.mrf.mxu1 }
 0x110   :  { %v710_v60 = vpack.c.bf16 %v776_v56, %v773_v55  ;;  %v730_v61 = vpack.c.bf16 %v1037_v57, %v1035_v52  ;;  %v558_v9 = vmul.f32 %v776_v56, %v776_v56  ;;  %v535_v19 = vadd.f32 %v776_v56, %v534_v12 }
 0x111   :  { %v778_v63 = vpop.f32.mrf.mxu0  ;;  %v802_v0 = vpop.f32.mrf.mxu1 }
 0x112   :  { %742 = vst [vmem:[#allocation8 + $0x8] sm:$0xff] %v710_v60   ;;  %746 = vst [vmem:[#allocation8 + $0x28] sm:$0xff] %v730_v61   ;;  %v779_v3 = vadd.f32 %v778_v63, %v777_v58  ;;  %v1041_v7 = vadd.f32 %v802_v0, %v801_v59  ;;  %v573_v22 = vadd.f32 %v572_v15, %v558_v9 }
 0x113   :  { %v780_v4 = vpop.f32.mrf.mxu0  ;;  %v804_v5 = vpop.f32.mrf.mxu1 }
 0x114   :  { %v559_v16 = vmul.f32 %v779_v3, %v779_v3  ;;  %v536_v26 = vadd.f32 %v779_v3, %v535_v19 }
 0x115   :  { %v781_v10 = vpop.f32.mrf.mxu0  ;;  %v805_v11 = vpop.f32.mrf.mxu1 }
 0x116   :  { %v782_v13 = vadd.f32 %v781_v10, %v780_v4  ;;  %v806_v14 = vadd.f32 %v805_v11, %v804_v5  ;;  %v574_v28 = vadd.f32 %v573_v22, %v559_v16 }
 0x117   :  { %v783_v17 = vpop.f32.mrf.mxu0  ;;  %v807_v18 = vpop.f32.mrf.mxu1 }
 0x118   :  { %v715_v20 = vpack.c.bf16 %v782_v13, %v779_v3  ;;  %v735_v21 = vpack.c.bf16 %v806_v14, %v1041_v7  ;;  %v560_v23 = vmul.f32 %v782_v13, %v782_v13  ;;  %v537_v31 = vadd.f32 %v782_v13, %v536_v26 }
 0x119   :  { %v784_v24 = vpop.f32.mrf.mxu0  ;;  %v808_v25 = vpop.f32.mrf.mxu1 }
 0x11a   :  { %743 = vst [vmem:[#allocation8 + $0x10] sm:$0xff] %v715_v20   ;;  %v785_v27 = vadd.f32 %v784_v24, %v783_v17  ;;  %747 = vst [vmem:[#allocation8 + $0x30] sm:$0xff] %v735_v21   ;;  %v809_v33 = vadd.f32 %v808_v25, %v807_v18  ;;  %v575_v34 = vadd.f32 %v574_v28, %v560_v23 }
 0x11b   :  { %v786_v29 = vpop.f32.mrf.mxu0  ;;  %v810_v30 = vpop.f32.mrf.mxu1 }
 0x11c   :  { %v561_v32 = vmul.f32 %v785_v27, %v785_v27  ;;  %v538_v37 = vadd.f32 %v785_v27, %v537_v31 }
 0x11d   :  { %v787_v35 = vpop.f32.mrf.mxu0  ;;  %v811_v36 = vpop.f32.mrf.mxu1 }
 0x11e   :  { %v788_v39 = vadd.f32 %v787_v35, %v786_v29  ;;  %v812_v40 = vadd.f32 %v811_v36, %v810_v30  ;;  %v576_v41 = vadd.f32 %v575_v34, %v561_v32 }
 0x120   :  { %v720_v42 = vpack.c.bf16 %v788_v39, %v785_v27  ;;  %v539_v44 = vadd.f32 %v788_v39, %v538_v37  ;;  %v562_v45 = vmul.f32 %v788_v39, %v788_v39  ;;  %v740_v46 = vpack.c.bf16 %v812_v40, %v809_v33 }
 0x122   :  { %744 = vst [vmem:[#allocation8 + $0x18] sm:$0xff] %v720_v42   ;;  %v540_v48 = vadd.f32 %v1029_v38, %v539_v44  ;;  %v577_v49 = vadd.f32 %v576_v41, %v562_v45  ;;  %748 = vst [vmem:[#allocation8 + $0x38] sm:$0xff] %v740_v46  }
 0x123   :  { %929 = shalt.err (!%p926_p0)
}
 0x124   :  { %604 = dma.vmem_to_hbm [thread:$0]  %s599_s1, 1024, %s1073_s2, [#allocation5], %s990_s25, %s990_s25, %s991_s26   ;;  %v564_v50 = vmul.f32 %v1031_v43, %v1031_v43  ;;  %v541_v38 = vadd.f32 %v1031_v43, %v540_v48  ;;  %v578_v51 = vadd.f32 %v577_v49, %v563_v47  ;;  %v565_v53 = vmul.f32 %v1035_v52, %v1035_v52 }
 0x125   :  { %v566_v56 = vmul.f32 %v1037_v57, %v1037_v57  ;;  %v567_v60 = vmul.f32 %v1041_v7, %v1041_v7  ;;  %v568_v63 = vmul.f32 %v806_v14, %v806_v14  ;;  %v569_v3 = vmul.f32 %v809_v33, %v809_v33  ;;  %s993_s2 = smov [#allocation9]   ;;  %s994_s7 = smov [#allocation11]  }
 0x126   :  { %v579_v54 = vadd.f32 %v578_v51, %v564_v50  ;;  %v542_v55 = vadd.f32 %v1035_v52, %v541_v38  ;;  %v570_v5 = vmul.f32 %v812_v40, %v812_v40  ;;  %s611_s6 = sshll.u32 %s993_s2, 4  ;;  %s621_s8 = sshll.u32 %s994_s7, 4  ;;  %s612_s6 = int_to_ptr.vmem [resolvable:$true] %s611_s6  ;;  %s622_s8 = int_to_ptr.vmem [resolvable:$true] %s621_s8 }
 0x127   :  { %s938_s9 = scalar_lea.vmem %s612_s6, 16  ;;  %s942_s10 = scalar_lea.vmem %s612_s6, 32 }
 0x128   :  { %v543_v58 = vadd.f32 %v1037_v57, %v542_v55  ;;  %v580_v59 = vadd.f32 %v579_v54, %v565_v53  ;;  %p939_p1 = scmp.ne.s32.totalorder %s612_s6, %s938_s9  ;;  %p943_p2 = scmp.lt.s32.totalorder %s612_s6, %s612_s6 }
 0x129   :  { %p944_p3 = scmp.lt.s32.totalorder %s942_s10, %s938_s9 }
 0x12a   :  { %v544_v61 = vadd.f32 %v1041_v7, %v543_v58  ;;  %v581_v62 = vadd.f32 %v580_v59, %v566_v56 }
 0x12b   :  { %p945_p4 = por %p944_p3, %p943_p2 }
 0x12c   :  { %v545_v43 = vadd.f32 %v806_v14, %v544_v61  ;;  %v582_v0 = vadd.f32 %v581_v62, %v567_v60 }
 0x12d   :  { %p946_p5 = pnand %p945_p4, %p939_p1 }
 0x12e   :  { %v583_v1 = vadd.f32 %v582_v0, %v568_v63  ;;  %v546_v2 = vadd.f32 %v809_v33, %v545_v43 }
 0x130   :  { %v584_v4 = vadd.f32 %v583_v1, %v569_v3  ;;  %v547_v52 = vadd.f32 %v812_v40, %v546_v2 }
 0x132   :  { %v548_v6 = vrot.slane %v547_v52, 4  ;;  %v585_v8 = vadd.f32 %v584_v4, %v570_v5 }
 0x134   :  { %v549_v9 = vadd.f32 %v548_v6, %v547_v52  ;;  %v586_v57 = vrot.slane %v585_v8, 4 }
 0x136   :  { %v587_v10 = vadd.f32 %v586_v57, %v585_v8  ;;  %v550_v11 = vrot.slane %v549_v9, 2 }
 0x138   :  { %v551_v12 = vadd.f32 %v550_v11, %v549_v9  ;;  %v588_v13 = vrot.slane %v587_v10, 2 }
 0x13a   :  { %v552_v7 = vrot.slane %v551_v12, 1  ;;  %v589_v15 = vadd.f32 %v588_v13, %v587_v10 }
 0x13c   :  { %v553_v14 = vadd.f32 %v552_v7, %v551_v12  ;;  %v590_v16 = vrot.slane %v589_v15, 1 }
 0x13e   :  { %554 = vst [vmem:[#allocation9] sm:$0x1] %v553_v14  ;;  %v591_v17 = vadd.f32 %v590_v16, %v589_v15 }
 0x13f   :  { %949 = shalt.err (!%p946_p5)
}
 0x140   :  { %614 = dma.vmem_to_hbm [thread:$0]  %s612_s6, 16, %s1074_s3, [#allocation10]   ;;  %592 = vst [vmem:[#allocation11] sm:$0x1] %v591_v17 }
 0x141   :  { %s958_s13 = scalar_lea.vmem %s622_s8, 16  ;;  %s962_s14 = scalar_lea.vmem %s622_s8, 32 }
 0x142   :  { %p959_p6 = scmp.ne.s32.totalorder %s622_s8, %s958_s13  ;;  %p963_p7 = scmp.lt.s32.totalorder %s622_s8, %s622_s8 }
 0x143   :  { %p964_p8 = scmp.lt.s32.totalorder %s962_s14, %s958_s13 }
 0x145   :  { %p965_p9 = por %p964_p8, %p963_p7 }
 0x147   :  { %p966_p10 = pnand %p965_p9, %p959_p6 }
 0x149   :  { %969 = shalt.err (!%p966_p10)
}
 0x14a   :  { %624 = dma.vmem_to_hbm [thread:$0]  %s622_s8, 16, %s1075_s4, [#allocation10]  }
 0x14b   :  { %982 = dma.done.wait [#allocation5], 1024  }
 0x14c   :  { %983 = vsyncadd [#allocation5], 4294966272 }
 0x14d   :  { %984 = dma.done.wait [#allocation10], 32  }
 0x14e   :  { %985 = vsyncadd [#allocation10], 4294967264 }
 0x14f   :  { %634 = vsyncpa [#allocation4], 1 }
 0x150   :  { %635 = vsyncpa [#allocation7], 1 }
 0x151   :  { %636 = vsyncpa [#allocation5], 1 }
 0x152   :  { %637 = vsyncpa [#allocation10], 1 }

</bundles_post_ra>
